<compile_context>
chip_gen: v7x
topology: tpu7x:2x2x1
jax: 0.10.0
libtpu: 0.0.40
codegen_flags: <defaults>
</compile_context>

<pallas_src>
import functools

import jax
import jax.numpy as jnp
from jax.experimental import pallas as pl
from jax.experimental.pallas import tpu as pltpu


def _round_up(x, m):
    return ((x + m - 1) // m) * m


def _ls_ce_kernel(n_ref, x_ref, t_ref, out_ref,
                  col_ref, acc_smooth, acc_nll, acc_cnt,
                  *, ignore_index, steps_total, steps_per_chunk):
    chunk = pl.program_id(0)      # "parallel" axis (megacore sharding on v7x)
    i = pl.program_id(1)          # "arbitrary" reduction axis within the chunk
    row_tile, c_dim = x_ref.shape
    inv_c = 1.0 / c_dim

    @pl.when(i == 0)
    def _():
        # Per-chunk (and hence per-core) init: accumulators + hoisted col iota.
        col_ref[...] = jax.lax.broadcasted_iota(jnp.int32, col_ref.shape, 1)
        acc_smooth[...] = jnp.zeros_like(acc_smooth)
        acc_nll[...] = jnp.zeros_like(acc_nll)
        acc_cnt[...] = jnp.zeros_like(acc_cnt)

    # The index_map clamps the row-block index to stay in bounds; recompute the
    # same clamped block here so the row mask matches the data actually loaded,
    # and kill the whole step if it is a duplicate (past steps_total).
    step = chunk * steps_per_chunk + i
    blk = jnp.minimum(step, steps_total - 1)
    step_ok = step < steps_total

    x_nat = x_ref[...]            # native dtype (bf16 stays bf16 from HBM)
    t = t_ref[...]                # (row_tile, 1) int32
    col = col_ref[...]            # (row_tile, C) int32, hoisted iota

    # Row max + one-hot gather on the native dtype (exact), upcast the results.
    m = jnp.max(x_nat, axis=-1, keepdims=True).astype(jnp.float32)          # (TN,1)
    x_tgt = jnp.sum(jnp.where(col == t, x_nat, 0), axis=-1,
                    keepdims=True).astype(jnp.float32)                       # (TN,1)

    x = x_nat.astype(jnp.float32)
    lse = m + jnp.log(jnp.sum(jnp.exp(x - m), axis=-1, keepdims=True))       # (TN,1)
    mean_x = jnp.sum(x, axis=-1, keepdims=True) * inv_c                      # (TN,1)

    # Mask padded / out-of-range rows; all masking is select-based so NaN/garbage
    # in the partial-tail block cannot leak into the accumulators.
    row_idx = blk * row_tile + jax.lax.broadcasted_iota(jnp.int32, (row_tile, 1), 0)
    row_valid = jnp.logical_and(row_idx < n_ref[0], step_ok)                 # (TN,1)
    tgt_valid = jnp.logical_and(t != ignore_index, row_valid)                # (TN,1)

    # Smoothing term pre-scaled by 1/C:  (C*lse - sum_c x)/C = lse - mean_x.
    acc_smooth[...] += jnp.where(row_valid, lse - mean_x, 0.0)
    # NLL term:  lse - x[target].
    acc_nll[...] += jnp.where(tgt_valid, lse - x_tgt, 0.0)
    acc_cnt[...] += tgt_valid.astype(jnp.float32)

    @pl.when(i == pl.num_programs(1) - 1)
    def _():
        smooth_sum = jnp.sum(acc_smooth[...])
        nll_sum = jnp.sum(acc_nll[...])
        cnt_sum = jnp.sum(acc_cnt[...])
        lane = jax.lax.broadcasted_iota(jnp.int32, out_ref.shape, 1)
        out_ref[...] = jnp.where(lane == 0, smooth_sum,
                                 jnp.where(lane == 1, nll_sum,
                                           jnp.where(lane == 2, cnt_sum, 0.0)))


def label_smoothing_cross_entropy(logits, target, *, eps=0.1,
                                  reduction='mean', ignore_index=-100,
                                  row_tile=None):
    """logits: (..., C) float (any dtype); target: (...,) int. Returns scalar loss."""
    assert reduction in ('mean', 'sum')
    c = logits.shape[-1]
    x = logits.reshape(-1, c)                      # native dtype, never copied/padded
    t = target.reshape(-1, 1).astype(jnp.int32)
    n = x.shape[0]

    # Sublane packing multiple for the logits dtype (f32:8, bf16:16, int8/fp8:32).
    itemsize = jnp.dtype(x.dtype).itemsize
    sub = max(8, 32 // max(1, itemsize))

    if row_tile is None:
        # ~4 MiB of native-dtype logits per block (good amortization on v7x's
        # 3.2 TB/s HBM), capped at 2048 rows; with the f32 upcast / exp temps and
        # the int32 col-iota scratch this stays under the 48 MiB VMEM limit.
        budget_rows = max(sub, (4 * 1024 * 1024) // max(1, c * itemsize))
        row_tile = int(min(2048, budget_rows))
    row_tile = max(sub, min(_round_up(row_tile, sub), _round_up(n, sub)))

    steps_total = pl.cdiv(n, row_tile)
    # Two row-chunks on the leading "parallel" axis -> sharded across the two
    # TensorCores on v7x; runs sequentially (negligible overhead) on 1-TC chips.
    num_chunks = 2 if steps_total >= 2 else 1
    steps_per_chunk = pl.cdiv(steps_total, num_chunks)

    kernel = functools.partial(_ls_ce_kernel,
                               ignore_index=ignore_index,
                               steps_total=steps_total,
                               steps_per_chunk=steps_per_chunk)

    # Clamp the row-block index so duplicate trailing steps re-read the last
    # valid block (never a fully out-of-bounds DMA); the kernel masks them out.
    row_map = lambda chunk, i, n_ref: (
        jnp.minimum(chunk * steps_per_chunk + i, steps_total - 1), 0)

    out = pl.pallas_call(
        kernel,
        out_shape=jax.ShapeDtypeStruct((num_chunks * 8, 128), jnp.float32),
        grid_spec=pltpu.PrefetchScalarGridSpec(
            num_scalar_prefetch=1,
            grid=(num_chunks, steps_per_chunk),
            in_specs=[pl.BlockSpec((row_tile, c), row_map),
                      pl.BlockSpec((row_tile, 1), row_map)],
            out_specs=pl.BlockSpec((8, 128), lambda chunk, i, n_ref: (chunk, 0)),
            scratch_shapes=[pltpu.VMEM((row_tile, c), jnp.int32),   # hoisted col iota
                            pltpu.VMEM((row_tile, 1), jnp.float32),  # smooth acc
                            pltpu.VMEM((row_tile, 1), jnp.float32),  # nll acc
                            pltpu.VMEM((row_tile, 1), jnp.float32)]  # valid count
        ),
        compiler_params=pltpu.CompilerParams(
            dimension_semantics=("parallel", "arbitrary"),
            vmem_limit_bytes=48 * 1024 * 1024),
    )(jnp.array([n], dtype=jnp.int32), x, t)

    parts = out.reshape(num_chunks, 8, 128)[:, 0, :3]   # (chunks, 3) partial sums
    smooth_total = parts[:, 0].sum()   # sum over rows of (lse - mean_c x)
    nll_total = parts[:, 1].sum()      # sum over non-ignored rows of (lse - x[tgt])
    cnt_total = parts[:, 2].sum()      # number of non-ignored rows

    if reduction == 'mean':
        # Smoothing term averages over ALL rows (matches the fastai/TPLinker
        # definition); NLL averages over non-ignored rows. cnt_total == 0 (all
        # targets ignored) yields NaN, matching PyTorch.
        return eps * smooth_total / n + (1.0 - eps) * nll_total / cnt_total
    return eps * smooth_total + (1.0 - eps) * nll_total


def _reference(logits, target, eps=0.1, ignore_index=-100, reduction='mean'):
    """Pure-JAX reimplementation of the PyTorch forward."""
    c = logits.shape[-1]
    x = logits.reshape(-1, c).astype(jnp.float32)
    t = target.reshape(-1)
    lp = jax.nn.log_softmax(x, axis=-1)
    valid = t != ignore_index
    safe_t = jnp.where(valid, t, 0)
    nll = -jnp.take_along_axis(lp, safe_t[:, None], axis=1)[:, 0]
    nll = jnp.where(valid, nll, 0.0)
    if reduction == 'mean':
        smooth = (-lp.sum(axis=-1)).mean() * eps / c
        return smooth + (1.0 - eps) * nll.sum() / valid.sum()
    smooth = (-lp.sum()) * eps / c
    return smooth + (1.0 - eps) * nll.sum()


if __name__ == "__main__":
    key = jax.random.PRNGKey(0)

    # Test 1: module-spec shapes (batch, shaking_seq_len, type_size), mean + ignore_index.
    B, S, C = 2, 8, 5
    k1, k2, k3, k4 = jax.random.split(key, 4)
    logits = jax.random.normal(k1, (B, S, C), dtype=jnp.float32)
    target = jax.random.randint(k2, (B, S), 0, C, dtype=jnp.int32)
    target = target.at[0, 0].set(-100)   # exercise ignore_index
    loss = label_smoothing_cross_entropy(logits, target, eps=0.1,
                                         reduction='mean', ignore_index=-100)
    loss = jax.block_until_ready(loss)
    ref = _reference(logits, target)
    assert jnp.allclose(loss, ref, rtol=1e-5, atol=1e-5), (loss, ref)

    # Test 2: non-divisible row count + forced small tile -> exercises the
    # partial last block, the duplicate-step masking and the 2-chunk combine.
    B2, S2 = 3, 7                        # n = 21 rows, row_tile = 8 -> 3 steps
    logits2 = jax.random.normal(k3, (B2, S2, C), dtype=jnp.float32)
    target2 = jax.random.randint(k4, (B2, S2), 0, C, dtype=jnp.int32)
    target2 = target2.at[1, 3].set(-100)
    loss2 = label_smoothing_cross_entropy(logits2, target2, eps=0.1,
                                          reduction='mean', ignore_index=-100,
                                          row_tile=8)
    loss2 = jax.block_until_ready(loss2)
    ref2 = _reference(logits2, target2)
    assert jnp.allclose(loss2, ref2, rtol=1e-5, atol=1e-5), (loss2, ref2)

    # Test 3: reduction='sum' on the same data.
    loss3 = label_smoothing_cross_entropy(logits2, target2, eps=0.1,
                                          reduction='sum', ignore_index=-100,
                                          row_tile=8)
    loss3 = jax.block_until_ready(loss3)
    ref3 = _reference(logits2, target2, reduction='sum')
    assert jnp.allclose(loss3, ref3, rtol=1e-5, atol=1e-4), (loss3, ref3)

    print("KERNEL_OK")
</pallas_src>

<mosaic_0001>
module attributes {stable_mosaic.version = 11 : i64} {
  func.func @_ls_ce_kernel(%arg0: i32, %arg1: i32, %arg2: memref<1xi32, #tpu.memory_space<smem>>, %arg3: memref<16x5xf32, #tpu.memory_space<vmem>>, %arg4: memref<16x1xi32, #tpu.memory_space<vmem>>, %arg5: memref<8x128xf32, #tpu.memory_space<vmem>>, %arg6: memref<16x5xi32, #tpu.memory_space<vmem>>, %arg7: memref<16x1xf32, #tpu.memory_space<vmem>>, %arg8: memref<16x1xf32, #tpu.memory_space<vmem>>, %arg9: memref<16x1xf32, #tpu.memory_space<vmem>>) attributes {dimension_semantics = [#tpu.dimension_semantics<parallel>, #tpu.dimension_semantics<arbitrary>], iteration_bounds = array<i64: 1, 1>, scalar_prefetch = 1 : i64, scratch_operands = 4 : i64, tpu.core_type = #tpu.core_type<tc>, window_params = [{transform_indices = @transform_0, window_bounds = array<i64: 16, 5>}, {transform_indices = @transform_1, window_bounds = array<i64: 16, 1>}, {transform_indices = @transform_2, window_bounds = array<i64: 8, 128>}]} {
    %c0_i32 = arith.constant 0 : i32
    %0 = arith.cmpi eq, %arg1, %c0_i32 : i32
    %1 = arith.extui %0 : i1 to i32
    %c0_i32_0 = arith.constant 0 : i32
    %2 = arith.cmpi ne, %1, %c0_i32_0 : i32
    scf.if %2 {
      %62 = tpu.iota {dimensions = array<i32: 1>} : vector<16x5xi32>
      %c0_30 = arith.constant 0 : index
      %c0_31 = arith.constant 0 : index
      %63 = vector.load %arg6[%c0_30, %c0_31] : memref<16x5xi32, #tpu.memory_space<vmem>>, vector<16x5xi32>
      tpu.vector_store %arg6[%c0_30, %c0_31], %62 {strides = array<i32>} : memref<16x5xi32, #tpu.memory_space<vmem>>, vector<16x5xi32>,
      %cst_32 = arith.constant 0.000000e+00 : f32
      %64 = vector.broadcast %cst_32 : f32 to vector<16x1xf32>
      %c0_33 = arith.constant 0 : index
      %c0_34 = arith.constant 0 : index
      %65 = vector.load %arg7[%c0_33, %c0_34] : memref<16x1xf32, #tpu.memory_space<vmem>>, vector<16x1xf32>
      tpu.vector_store %arg7[%c0_33, %c0_34], %64 {strides = array<i32>} : memref<16x1xf32, #tpu.memory_space<vmem>>, vector<16x1xf32>,
      %cst_35 = arith.constant 0.000000e+00 : f32
      %66 = vector.broadcast %cst_35 : f32 to vector<16x1xf32>
      %c0_36 = arith.constant 0 : index
      %c0_37 = arith.constant 0 : index
      %67 = vector.load %arg8[%c0_36, %c0_37] : memref<16x1xf32, #tpu.memory_space<vmem>>, vector<16x1xf32>
      tpu.vector_store %arg8[%c0_36, %c0_37], %66 {strides = array<i32>} : memref<16x1xf32, #tpu.memory_space<vmem>>, vector<16x1xf32>,
      %cst_38 = arith.constant 0.000000e+00 : f32
      %68 = vector.broadcast %cst_38 : f32 to vector<16x1xf32>
      %c0_39 = arith.constant 0 : index
      %c0_40 = arith.constant 0 : index
      %69 = vector.load %arg9[%c0_39, %c0_40] : memref<16x1xf32, #tpu.memory_space<vmem>>, vector<16x1xf32>
      tpu.vector_store %arg9[%c0_39, %c0_40], %68 {strides = array<i32>} : memref<16x1xf32, #tpu.memory_space<vmem>>, vector<16x1xf32>,
    } else {
    }
    %c1_i32 = arith.constant 1 : i32
    %3 = arith.muli %arg0, %c1_i32 : i32
    %4 = arith.addi %3, %arg1 : i32
    %c0_i32_1 = arith.constant 0 : i32
    %5 = arith.minsi %4, %c0_i32_1 : i32
    %c1_i32_2 = arith.constant 1 : i32
    %6 = arith.cmpi slt, %4, %c1_i32_2 : i32
    %c0 = arith.constant 0 : index
    %c0_3 = arith.constant 0 : index
    %7 = vector.load %arg3[%c0, %c0_3] : memref<16x5xf32, #tpu.memory_space<vmem>>, vector<16x5xf32>
    %c0_4 = arith.constant 0 : index
    %c0_5 = arith.constant 0 : index
    %8 = vector.load %arg4[%c0_4, %c0_5] : memref<16x1xi32, #tpu.memory_space<vmem>>, vector<16x1xi32>
    %c0_6 = arith.constant 0 : index
    %c0_7 = arith.constant 0 : index
    %9 = vector.load %arg6[%c0_6, %c0_7] : memref<16x5xi32, #tpu.memory_space<vmem>>, vector<16x5xi32>
    %cst = arith.constant dense<0xFF800000> : vector<16xf32>
    %10 = vector.multi_reduction <maximumf>, %7, %cst [1] : vector<16x5xf32> to vector<16xf32>
    %11 = vector.shape_cast %10 : vector<16xf32> to vector<16x1xf32>
    %12 = vector.broadcast %8 : vector<16x1xi32> to vector<16x5xi32>
    %13 = arith.cmpi eq, %9, %12 : vector<16x5xi32>
    %c0_i32_8 = arith.constant 0 : i32
    %14 = arith.sitofp %c0_i32_8 : i32 to f32
    %15 = vector.broadcast %14 : f32 to vector<16x5xf32>
    %16 = arith.select %13, %7, %15 : vector<16x5xi1>, vector<16x5xf32>
    %cst_9 = arith.constant dense<0.000000e+00> : vector<16xf32>
    %17 = vector.multi_reduction <add>, %16, %cst_9 [1] : vector<16x5xf32> to vector<16xf32>
    %18 = vector.shape_cast %17 : vector<16xf32> to vector<16x1xf32>
    %19 = vector.broadcast %11 : vector<16x1xf32> to vector<16x5xf32>
    %20 = arith.subf %7, %19 : vector<16x5xf32>
    %21 = math.exp %20 : vector<16x5xf32>
    %cst_10 = arith.constant dense<0.000000e+00> : vector<16xf32>
    %22 = vector.multi_reduction <add>, %21, %cst_10 [1] : vector<16x5xf32> to vector<16xf32>
    %23 = vector.shape_cast %22 : vector<16xf32> to vector<16x1xf32>
    %24 = math.log %23 : vector<16x1xf32>
    %25 = arith.addf %11, %24 : vector<16x1xf32>
    %cst_11 = arith.constant dense<0.000000e+00> : vector<16xf32>
    %26 = vector.multi_reduction <add>, %7, %cst_11 [1] : vector<16x5xf32> to vector<16xf32>
    %27 = vector.shape_cast %26 : vector<16xf32> to vector<16x1xf32>
    %cst_12 = arith.constant 2.000000e-01 : f32
    %28 = vector.broadcast %cst_12 : f32 to vector<16x1xf32>
    %29 = arith.mulf %27, %28 : vector<16x1xf32>
    %c16_i32 = arith.constant 16 : i32
    %30 = arith.muli %5, %c16_i32 : i32
    %31 = tpu.iota {dimensions = array<i32: 0>} : vector<16x1xi32>
    %32 = vector.broadcast %30 : i32 to vector<16x1xi32>
    %33 = arith.addi %32, %31 : vector<16x1xi32>
    %c0_13 = arith.constant 0 : index
    %34 = memref.load %arg2[%c0_13] : memref<1xi32, #tpu.memory_space<smem>>
    %35 = vector.broadcast %34 : i32 to vector<16x1xi32>
    %36 = arith.cmpi slt, %33, %35 : vector<16x1xi32>
    %37 = vector.broadcast %6 : i1 to vector<16x1xi1>
    %38 = arith.andi %36, %37 : vector<16x1xi1>
    %c-100_i32 = arith.constant -100 : i32
    %39 = vector.broadcast %c-100_i32 : i32 to vector<16x1xi32>
    %40 = arith.cmpi ne, %8, %39 : vector<16x1xi32>
    %41 = arith.andi %40, %38 : vector<16x1xi1>
    %c0_14 = arith.constant 0 : index
    %c0_15 = arith.constant 0 : index
    %42 = vector.load %arg7[%c0_14, %c0_15] : memref<16x1xf32, #tpu.memory_space<vmem>>, vector<16x1xf32>
    %43 = arith.subf %25, %29 : vector<16x1xf32>
    %cst_16 = arith.constant 0.000000e+00 : f32
    %44 = vector.broadcast %cst_16 : f32 to vector<16x1xf32>
    %45 = arith.select %38, %43, %44 : vector<16x1xi1>, vector<16x1xf32>
    %46 = arith.addf %42, %45 : vector<16x1xf32>
    %c0_17 = arith.constant 0 : index
    %c0_18 = arith.constant 0 : index
    %47 = vector.load %arg7[%c0_17, %c0_18] : memref<16x1xf32, #tpu.memory_space<vmem>>, vector<16x1xf32>
    tpu.vector_store %arg7[%c0_17, %c0_18], %46 {strides = array<i32>} : memref<16x1xf32, #tpu.memory_space<vmem>>, vector<16x1xf32>,
    %c0_19 = arith.constant 0 : index
    %c0_20 = arith.constant 0 : index
    %48 = vector.load %arg8[%c0_19, %c0_20] : memref<16x1xf32, #tpu.memory_space<vmem>>, vector<16x1xf32>
    %49 = arith.subf %25, %18 : vector<16x1xf32>
    %cst_21 = arith.constant 0.000000e+00 : f32
    %50 = vector.broadcast %cst_21 : f32 to vector<16x1xf32>
    %51 = arith.select %41, %49, %50 : vector<16x1xi1>, vector<16x1xf32>
    %52 = arith.addf %48, %51 : vector<16x1xf32>
    %c0_22 = arith.constant 0 : index
    %c0_23 = arith.constant 0 : index
    %53 = vector.load %arg8[%c0_22, %c0_23] : memref<16x1xf32, #tpu.memory_space<vmem>>, vector<16x1xf32>
    tpu.vector_store %arg8[%c0_22, %c0_23], %52 {strides = array<i32>} : memref<16x1xf32, #tpu.memory_space<vmem>>, vector<16x1xf32>,
    %c0_24 = arith.constant 0 : index
    %c0_25 = arith.constant 0 : index
    %54 = vector.load %arg9[%c0_24, %c0_25] : memref<16x1xf32, #tpu.memory_space<vmem>>, vector<16x1xf32>
    %55 = arith.extui %41 : vector<16x1xi1> to vector<16x1xi32>
    %56 = arith.sitofp %55 : vector<16x1xi32> to vector<16x1xf32>
    %57 = arith.addf %54, %56 : vector<16x1xf32>
    %c0_26 = arith.constant 0 : index
    %c0_27 = arith.constant 0 : index
    %58 = vector.load %arg9[%c0_26, %c0_27] : memref<16x1xf32, #tpu.memory_space<vmem>>, vector<16x1xf32>
    tpu.vector_store %arg9[%c0_26, %c0_27], %57 {strides = array<i32>} : memref<16x1xf32, #tpu.memory_space<vmem>>, vector<16x1xf32>,
    %c0_i32_28 = arith.constant 0 : i32
    %59 = arith.cmpi eq, %arg1, %c0_i32_28 : i32
    %60 = arith.extui %59 : i1 to i32
    %c0_i32_29 = arith.constant 0 : i32
    %61 = arith.cmpi ne, %60, %c0_i32_29 : i32
    scf.if %61 {
      %c0_30 = arith.constant 0 : index
      %c0_31 = arith.constant 0 : index
      %62 = vector.load %arg7[%c0_30, %c0_31] : memref<16x1xf32, #tpu.memory_space<vmem>>, vector<16x1xf32>
      %63 = vector.shape_cast %62 : vector<16x1xf32> to vector<1x16x1xf32>
      %cst_32 = arith.constant dense<0.000000e+00> : vector<1xf32>
      %64 = vector.multi_reduction <add>, %63, %cst_32 [1, 2] : vector<1x16x1xf32> to vector<1xf32>
      %65 = vector.shape_cast %64 : vector<1xf32> to vector<1x1x1xf32>
      %66 = vector.extract %65[0, 0, 0] : f32 from vector<1x1x1xf32>
      %c0_33 = arith.constant 0 : index
      %c0_34 = arith.constant 0 : index
      %67 = vector.load %arg8[%c0_33, %c0_34] : memref<16x1xf32, #tpu.memory_space<vmem>>, vector<16x1xf32>
      %68 = vector.shape_cast %67 : vector<16x1xf32> to vector<1x16x1xf32>
      %cst_35 = arith.constant dense<0.000000e+00> : vector<1xf32>
      %69 = vector.multi_reduction <add>, %68, %cst_35 [1, 2] : vector<1x16x1xf32> to vector<1xf32>
      %70 = vector.shape_cast %69 : vector<1xf32> to vector<1x1x1xf32>
      %71 = vector.extract %70[0, 0, 0] : f32 from vector<1x1x1xf32>
      %c0_36 = arith.constant 0 : index
      %c0_37 = arith.constant 0 : index
      %72 = vector.load %arg9[%c0_36, %c0_37] : memref<16x1xf32, #tpu.memory_space<vmem>>, vector<16x1xf32>
      %73 = vector.shape_cast %72 : vector<16x1xf32> to vector<1x16x1xf32>
      %cst_38 = arith.constant dense<0.000000e+00> : vector<1xf32>
      %74 = vector.multi_reduction <add>, %73, %cst_38 [1, 2] : vector<1x16x1xf32> to vector<1xf32>
      %75 = vector.shape_cast %74 : vector<1xf32> to vector<1x1x1xf32>
      %76 = vector.extract %75[0, 0, 0] : f32 from vector<1x1x1xf32>
      %77 = tpu.iota {dimensions = array<i32: 1>} : vector<8x128xi32>
      %c0_i32_39 = arith.constant 0 : i32
      %78 = vector.broadcast %c0_i32_39 : i32 to vector<8x128xi32>
      %79 = arith.cmpi eq, %77, %78 : vector<8x128xi32>
      %c1_i32_40 = arith.constant 1 : i32
      %80 = vector.broadcast %c1_i32_40 : i32 to vector<8x128xi32>
      %81 = arith.cmpi eq, %77, %80 : vector<8x128xi32>
      %c2_i32 = arith.constant 2 : i32
      %82 = vector.broadcast %c2_i32 : i32 to vector<8x128xi32>
      %83 = arith.cmpi eq, %77, %82 : vector<8x128xi32>
      %cst_41 = arith.constant 0.000000e+00 : f32
      %84 = vector.broadcast %76 : f32 to vector<8x128xf32>
      %85 = vector.broadcast %cst_41 : f32 to vector<8x128xf32>
      %86 = arith.select %83, %84, %85 : vector<8x128xi1>, vector<8x128xf32>
      %87 = vector.broadcast %71 : f32 to vector<8x128xf32>
      %88 = arith.select %81, %87, %86 : vector<8x128xi1>, vector<8x128xf32>
      %89 = vector.broadcast %66 : f32 to vector<8x128xf32>
      %90 = arith.select %79, %89, %88 : vector<8x128xi1>, vector<8x128xf32>
      %c0_42 = arith.constant 0 : index
      %c0_43 = arith.constant 0 : index
      %91 = vector.load %arg5[%c0_42, %c0_43] : memref<8x128xf32, #tpu.memory_space<vmem>>, vector<8x128xf32>
      tpu.vector_store %arg5[%c0_42, %c0_43], %90 {strides = array<i32>} : memref<8x128xf32, #tpu.memory_space<vmem>>, vector<8x128xf32>,
    } else {
    }
    return
  }
  func.func @transform_0(%arg0: i32, %arg1: i32, %arg2: memref<1xi32, #tpu.memory_space<smem>>) -> (i32, i32) {
    %c1_i32 = arith.constant 1 : i32
    %0 = arith.muli %arg0, %c1_i32 : i32
    %1 = arith.addi %0, %arg1 : i32
    %c0_i32 = arith.constant 0 : i32
    %2 = arith.minsi %1, %c0_i32 : i32
    %c0_i32_0 = arith.constant 0 : i32
    %c0_i32_1 = arith.constant 0 : i32
    return %2, %c0_i32_0 : i32, i32
  }
  func.func @transform_1(%arg0: i32, %arg1: i32, %arg2: memref<1xi32, #tpu.memory_space<smem>>) -> (i32, i32) {
    %c1_i32 = arith.constant 1 : i32
    %0 = arith.muli %arg0, %c1_i32 : i32
    %1 = arith.addi %0, %arg1 : i32
    %c0_i32 = arith.constant 0 : i32
    %2 = arith.minsi %1, %c0_i32 : i32
    %c0_i32_0 = arith.constant 0 : i32
    %c0_i32_1 = arith.constant 0 : i32
    return %2, %c0_i32_0 : i32, i32
  }
  func.func @transform_2(%arg0: i32, %arg1: i32, %arg2: memref<1xi32, #tpu.memory_space<smem>>) -> (i32, i32) {
    %c0_i32 = arith.constant 0 : i32
    %c0_i32_0 = arith.constant 0 : i32
    return %arg0, %c0_i32 : i32, i32
  }
}

</mosaic_0001>

<bundles_post_ra>
// kernel: tpu_custom_call.1
= control target key start
LH: loop header
LB: loop body
LE: loop exit
PB: predicated region body
PF: predicated region fallthrough
CT: control target
= control target key end

     0   :  { %vm84_vm0 = vcmask 39936   ;;  %v82_v3 = vlaneseq  ;;  %v332_v5 = vmov 0   ;;  %vm87_vm1 = vcmask 7168   ;;  %s449_s0 = inlined_call_operand.<no memory space> [shape: s32[1], index: 0, kind: input, shape index: {}]   ;;  %s450_s1 = inlined_call_operand.vmem [shape: f32[16,5], index: 1, kind: input, shape index: {}]   ;;  %s451_s2 = inlined_call_operand.vmem [shape: s32[16,1], index: 2, kind: input, shape index: {}]   ;;  %s452_s3 = inlined_call_operand.hbm [shape: f32[8,128], index: 3, kind: output, shape index: {}]  }
   0x1   :  { %v98_v0 = vld [vmem:[%s450_s1] sm:$0xff]  ;;  %v99_v1 = vld [vmem:[%s450_s1 + $0x8] sm:$0xff]  ;;  %298 = vset.pattern.permute.xlu1 %v332_v5  ;;  %v161_v6 = vstv %s449_s0  ;;  %299 = vset.pattern.permute.xlu0 %v332_v5  ;;  %v333_v8 = vmov 0.0  }
   0x2   :  { %v100_v2 = vld [vmem:[%s451_s2] sm:$0xff]  ;;  %v105_v4 = vsel %vm84_vm0, %v98_v0, -inf  ;;  %v368_v7 = vand.u32 127, %v82_v3  ;;  %92 = vst.msk [vmem:[#allocation5] sm:$0xff] %vm87_vm1, %v333_v8  ;;  %v155_v9 = vshrl.u32 %v82_v3, 7  ;;  %88 = vst.msk [vmem:[#allocation3] sm:$0xff] %vm87_vm1, %v333_v8 }
   0x3   :  { %106 = vmax.xlane.f32.xlu0 %v105_v4  ;;  %112 = vperm.xlu1 %298, %v100_v2   ;;  %89 = vst.msk [vmem:[#allocation3 + $0x8] sm:$0xff] %vm87_vm1, %v333_v8  ;;  %90 = vst.msk [vmem:[#allocation4] sm:$0xff] %vm87_vm1, %v333_v8 }
   0x4   :  { %91 = vst.msk [vmem:[#allocation4 + $0x8] sm:$0xff] %vm87_vm1, %v333_v8  ;;  %93 = vst.msk [vmem:[#allocation5 + $0x8] sm:$0xff] %vm87_vm1, %v333_v8 }
   0x5   :  { %9 = vsyncpa [#allocation9], 0  ;;  %v108_v10 = vsel %vm84_vm0, %v99_v1, -inf  ;;  %vm169_vm2 = vcmp.ne.s32.totalorder %v100_v2, 4294967196  ;;  %v101_v11 = vld [vmem:[%s451_s2 + $0x8] sm:$0xff]  ;;  %85 = vst.msk [vmem:[#allocation2] sm:$0xff] %vm84_vm0, %v368_v7  ;;  %vm384_vm3 = vcmp.lt.s32.totalorder %v155_v9, %v161_v6 }
   0x6   :  { %86 = vst.msk [vmem:[#allocation2 + $0x8] sm:$0xff] %vm84_vm0, %v368_v7  ;;  %vm390_vm4 = vmand %vm169_vm2, %vm384_vm3  ;;  %v145_v27 = vsel %vm84_vm0, %v98_v0, 0.0  ;;  %v148_v32 = vsel %vm84_vm0, %v99_v1, 0.0  ;;  %v156_v37 = vadd.s32 8, %v155_v9  ;;  %vm170_vm7 = vcmp.ne.s32.totalorder %v101_v11, 4294967196  ;;  %s334_s22 = smov [#allocation8]  }
   0x7   :  { %109 = vmax.xlane.f32.xlu0 %v108_v10  ;;  %115 = vperm.xlu1 %298, %v101_v11   ;;  %v287_v14 = vsel %vm390_vm4, 1.0, %v333_v8  ;;  %vm253_vm10 = vcmp.eq.s32.totalorder %v368_v7, 2  ;;  %vm252_vm11 = vcmp.eq.s32.totalorder %v368_v7, 1  ;;  %s267_s23 = sshll.u32 %s334_s22, 4  ;;  %vm251_vm12 = vcmp.eq.s32.totalorder %v368_v7, 0  ;;  %s268_s23 = int_to_ptr.vmem [resolvable:$true] %s267_s23 }
   0x8   :  { %vm403_vm8 = vcmp.lt.s32.totalorder %v156_v37, %v161_v6  ;;  %s308_s24 = scalar_lea.vmem %s268_s23, 128  ;;  %p313_p1 = scmp.lt.s32.totalorder %s268_s23, %s268_s23 }
   0x9   :  { %v194_v15 = vld [vmem:[#allocation5] sm:$0xff]  ;;  %vm409_vm9 = vmand %vm170_vm7, %vm403_vm8  ;;  %p309_p0 = scmp.ne.s32.totalorder %s268_s23, %s308_s24  ;;  %p314_p2 = scmp.lt.s32.totalorder %s308_s24, %s308_s24 }
   0xa   :  { %v200_v16 = vadd.f32 %v287_v14, %v194_v15  ;;  %v288_v41 = vsel %vm409_vm9, 1.0, %v333_v8  ;;  %v173_v54 = vld [vmem:[#allocation3] sm:$0xff]  ;;  %v184_v56 = vld [vmem:[#allocation4] sm:$0xff] }
   0xb   :  { %v195_v40 = vld [vmem:[#allocation5 + $0x8] sm:$0xff]  ;;  %v185_v3 = vld [vmem:[#allocation4 + $0x8] sm:$0xff]  ;;  %p315_p3 = por %p314_p2, %p313_p1 }
   0xc   :  { %202 = vst.msk [vmem:[#allocation5] sm:$0xff] %vm87_vm1, %v200_v16  ;;  %v102_v26 = vld [vmem:[#allocation2] sm:$0xff]  ;;  %v201_v42 = vadd.f32 %v288_v41, %v195_v40 }
   0xd   :  { %v103_v31 = vld [vmem:[#allocation2 + $0x8] sm:$0xff]  ;;  %p316_p4 = pnand %p315_p3, %p309_p0 }
   0xe   :  { %203 = vst.msk [vmem:[#allocation5 + $0x8] sm:$0xff] %vm87_vm1, %v201_v42 }
  0x82   :  { %v113_v24 = vpop.permute.xlu1 %112 }
  0x83   :  { %vm117_vm5 = vcmp.eq.s32.totalorder %v102_v26, %v113_v24 }
  0x84   :  { %v119_v33 = vsel %vm117_vm5, %v98_v0, 0.0 }
  0x85   :  { %v121_v34 = vsel %vm84_vm0, %v119_v33, 0.0 }
  0x86   :  { %v116_v30 = vpop.permute.xlu1 %115 }
  0x87   :  { %vm118_vm6 = vcmp.eq.s32.totalorder %v103_v31, %v116_v30 }
  0x88   :  { %v120_v35 = vsel %vm118_vm6, %v99_v1, 0.0 }
  0x89   :  { %v124_v36 = vsel %vm84_vm0, %v120_v35, 0.0 }
  0x90   :  { %v107_v17 = vpop.xlane.xlu0 %106 }
  0x91   :  { %v127_v18 = vsub.f32 %v98_v0, %v107_v17 }
  0x93   :  { %v129_v19 = vmul.f32 1.442695, %v127_v18  ;;  %v236_v18 = vld [vmem:[#allocation5 + $0x8] sm:$0xff] }
  0x94   :  { %v110_v20 = vpop.xlane.xlu0 %109 }
  0x95   :  { %300 = vpow2.f32 %v129_v19  ;;  %v128_v21 = vsub.f32 %v99_v1, %v110_v20  ;;  %v174_v1 = vld [vmem:[#allocation3 + $0x8] sm:$0xff] }
  0x97   :  { %v131_v22 = vmul.f32 1.442695, %v128_v21 }
  0x99   :  { %302 = vpow2.f32 %v131_v22  ;;  %v238_v22 = vsel %vm87_vm1, %v236_v18, 0.0 }
  0x9f   :  { %v301_v23 = vpop.eup %300 }
  0xa0   :  { %v133_v25 = vsel %vm84_vm0, %v301_v23, 0.0 }
  0xa1   :  { %134 = vadd.xlane.f32.xlu0 %v133_v25 }
  0xa3   :  { %v303_v28 = vpop.eup %302 }
  0xa4   :  { %v136_v29 = vsel %vm84_vm0, %v303_v28, 0.0 }
  0xa5   :  { %137 = vadd.xlane.f32.xlu1 %v136_v29  ;;  %146 = vadd.xlane.f32.xlu0 %v145_v27 }
  0xa9   :  { %149 = vadd.xlane.f32.xlu0 %v148_v32 }
  0xad   :  { %122 = vadd.xlane.f32.xlu0 %v121_v34 }
  0xb1   :  { %125 = vadd.xlane.f32.xlu0 %v124_v36 }
 0x12e   :  { %v135_v43 = vpop.xlane.xlu0 %134 }
 0x12f   :  { %304 = vlog2.f32 %v135_v43 }
 0x132   :  { %v138_v44 = vpop.xlane.xlu1 %137  ;;  %v147_v45 = vpop.xlane.xlu0 %146 }
 0x133   :  { %306 = vlog2.f32 %v138_v44  ;;  %v151_v51 = vmul.f32 0.2, %v147_v45 }
 0x136   :  { %v150_v46 = vpop.xlane.xlu0 %149 }
 0x137   :  { %v152_v61 = vmul.f32 0.2, %v150_v46 }
 0x139   :  { %v305_v47 = vpop.eup %304 }
 0x13a   :  { %v140_v48 = vmul.f32 0.6931472, %v305_v47  ;;  %v123_v49 = vpop.xlane.xlu0 %122 }
 0x13c   :  { %v143_v50 = vadd.f32 %v140_v48, %v107_v17  ;;  %v235_v17 = vld [vmem:[#allocation5] sm:$0xff] }
 0x13d   :  { %v307_v52 = vpop.eup %306  ;;  %v237_v21 = vsel %vm87_vm1, %v235_v17, 0.0 }
 0x13e   :  { %v142_v53 = vmul.f32 0.6931472, %v307_v52  ;;  %v175_v55 = vsub.f32 %v143_v50, %v151_v51  ;;  %v186_v57 = vsub.f32 %v143_v50, %v123_v49  ;;  %v126_v58 = vpop.xlane.xlu0 %125  ;;  %v239_v24 = vadd.f32 %v238_v22, %v237_v21 }
 0x140   :  { %v177_v59 = vsel %vm384_vm3, %v175_v55, 0.0  ;;  %v144_v60 = vadd.f32 %v142_v53, %v110_v20  ;;  %v188_v62 = vsel %vm390_vm4, %v186_v57, 0.0 }
 0x141   :  { %v179_v63 = vadd.f32 %v177_v59, %v173_v54  ;;  %v190_v0 = vadd.f32 %v188_v62, %v184_v56 }
 0x142   :  { %v176_v2 = vsub.f32 %v144_v60, %v152_v61  ;;  %v187_v4 = vsub.f32 %v144_v60, %v126_v58 }
 0x143   :  { %182 = vst.msk [vmem:[#allocation3] sm:$0xff] %vm87_vm1, %v179_v63  ;;  %192 = vst.msk [vmem:[#allocation4] sm:$0xff] %vm87_vm1, %v190_v0 }
 0x144   :  { %v178_v5 = vsel %vm403_vm8, %v176_v2, 0.0  ;;  %v189_v6 = vsel %vm409_vm9, %v187_v4, 0.0 }
 0x145   :  { %v180_v8 = vadd.f32 %v178_v5, %v174_v1  ;;  %v191_v9 = vadd.f32 %v189_v6, %v185_v3 }
 0x147   :  { %183 = vst.msk [vmem:[#allocation3 + $0x8] sm:$0xff] %vm87_vm1, %v180_v8  ;;  %193 = vst.msk [vmem:[#allocation4 + $0x8] sm:$0xff] %vm87_vm1, %v191_v9 }
 0x14a   :  { %v207_v10 = vld [vmem:[#allocation3] sm:$0xff]  ;;  %v221_v16 = vld [vmem:[#allocation4] sm:$0xff] }
 0x14b   :  { %v209_v13 = vsel %vm87_vm1, %v207_v10, 0.0  ;;  %v223_v20 = vsel %vm87_vm1, %v221_v16, 0.0 }
 0x14e   :  { %v208_v11 = vld [vmem:[#allocation3 + $0x8] sm:$0xff]  ;;  %v222_v12 = vld [vmem:[#allocation4 + $0x8] sm:$0xff] }
 0x14f   :  { %v210_v14 = vsel %vm87_vm1, %v208_v11, 0.0  ;;  %v224_v19 = vsel %vm87_vm1, %v222_v12, 0.0 }
 0x150   :  { %v211_v15 = vadd.f32 %v210_v14, %v209_v13  ;;  %v225_v23 = vadd.f32 %v224_v19, %v223_v20 }
 0x152   :  { %212 = vadd.xlane.f32.xlu0 %v211_v15 }
 0x156   :  { %226 = vadd.xlane.f32.xlu0 %v225_v23 }
 0x15a   :  { %240 = vadd.xlane.f32.xlu0 %v239_v24 }
 0x1df   :  { %v213_v25 = vpop.xlane.xlu0 %212 }
 0x1e0   :  { %v214_v26 = vrot.slane %v213_v25, 4 }
 0x1e2   :  { %v215_v27 = vadd.f32 %v214_v26, %v213_v25 }
 0x1e3   :  { %v227_v28 = vpop.xlane.xlu0 %226 }
 0x1e4   :  { %v216_v29 = vrot.slane %v215_v27, 2  ;;  %v228_v30 = vrot.slane %v227_v28, 4 }
 0x1e6   :  { %v229_v31 = vadd.f32 %v228_v30, %v227_v28  ;;  %v217_v32 = vadd.f32 %v216_v29, %v215_v27 }
 0x1e7   :  { %v241_v33 = vpop.xlane.xlu0 %240 }
 0x1e8   :  { %v230_v34 = vrot.slane %v229_v31, 2  ;;  %v242_v35 = vrot.slane %v241_v33, 4  ;;  %v218_v36 = vrot.slane %v217_v32, 1 }
 0x1ea   :  { %v243_v37 = vadd.f32 %v242_v35, %v241_v33  ;;  %v219_v38 = vadd.f32 %v218_v36, %v217_v32  ;;  %v231_v39 = vadd.f32 %v230_v34, %v229_v31 }
 0x1ec   :  { %v244_v40 = vrot.slane %v243_v37, 2  ;;  %289 = vpush %v219_v38  ;;  %v232_v41 = vrot.slane %v231_v39, 1 }
 0x1ee   :  { %v245_v42 = vadd.f32 %v244_v40, %v243_v37  ;;  %v233_v43 = vadd.f32 %v232_v41, %v231_v39 }
 0x1f0   :  { %291 = vpush %v233_v43  ;;  %v246_v44 = vrot.slane %v245_v42, 1 }
 0x1f2   :  { %v247_v45 = vadd.f32 %v246_v44, %v245_v42 }
 0x1f4   :  { %293 = vpush %v247_v45 }
 0x21d   :  { %s290_s2 = spop %289 }
 0x21e   :  { %v258_v49 = vstv %s290_s2 }
 0x221   :  { %s292_s20 = spop %291 }
 0x222   :  { %v256_v47 = vstv %s292_s20 }
 0x225   :  { %s294_s21 = spop %293 }
 0x226   :  { %v254_v46 = vstv %s294_s21 }
 0x227   :  { %v255_v48 = vsel %vm253_vm10, %v254_v46, 0.0 }
 0x228   :  { %v257_v50 = vsel %vm252_vm11, %v256_v47, %v255_v48 }
 0x229   :  { %v259_v51 = vsel %vm251_vm12, %v258_v49, %v257_v50 }
 0x22a   :  { %260 = vst [vmem:[#allocation8] sm:$0xff] %v259_v51 }
 0x22b   :  { %319 = shalt.err (!%p316_p4)
}
 0x22c   :  { %s320_s27 = scalar_lea.hbm %s452_s3, 128 }
 0x22d   :  { %p321_p5 = scmp.ne.s32.totalorder %s452_s3, %s320_s27  ;;  %p324_p6 = scmp.lt.u32.totalorder %s320_s27, %s452_s3 }
 0x22f   :  { %p326_p7 = pnand %p324_p6, %p321_p5 }
 0x231   :  { %329 = shalt.err (!%p326_p7)
}
 0x232   :  { %270 = dma.vmem_to_hbm [thread:$0]  %s268_s23, 128, %s452_s3, [#allocation9]  }
 0x233   :  { %330 = dma.done.wait [#allocation9], 128  }
 0x234   :  { %331 = vsyncadd [#allocation9], 4294967168 }
 0x235   :  { %274 = vsyncpa [#allocation9], 1 }

</bundles_post_ra>
